<compile_context>
chip_gen: v5e
topology: v5e:2x2
jax: 0.10.0
libtpu: 0.0.40
codegen_flags: <defaults>
</compile_context>

<pallas_src>
import jax
import jax.numpy as jnp
from jax.experimental import pallas as pl
from jax.experimental.pallas import tpu as pltpu


def _round_up(x, m):
    return ((x + m - 1) // m) * m


def _chip_params():
    """Returns (vmem_capacity_bytes, k_alignment) with conservative fallbacks."""
    vmem_cap = None
    try:
        vmem_cap = int(pltpu.get_tpu_info().vmem_capacity_bytes)
    except Exception:
        pass
    k_align = 256  # fill the 256-deep MXU contraction on v6e/v7x
    try:
        kind = jax.devices()[0].device_kind.lower()
        if any(t in kind for t in ("v2", "v3", "v4", "v5")):
            k_align = 128  # v5e MXU is 4x128x128; 256 would only add DMA bytes
        if vmem_cap is None:
            vmem_cap = (64 << 20) if "v7" in kind else (128 << 20)
    except Exception:
        pass
    if vmem_cap is None:
        vmem_cap = 64 << 20  # assume the smallest (v7x per-core) VMEM
    return vmem_cap, k_align


def _patch_embed_kernel(x_ref, w_ref, b_ref, o_ref):
    # x_ref: (TM, Kp)  patch rows for this grid step (bf16 or f32)
    # w_ref: (Kp, Fp)  projection weight, resident across all M tiles
    # b_ref: (1,  Fp)  bias, kept in f32 so it adds on the f32 accumulator
    # o_ref: (TM, Fp)
    acc = jnp.dot(x_ref[...], w_ref[...], preferred_element_type=jnp.float32)
    o_ref[...] = (acc + b_ref[...]).astype(o_ref.dtype)


def patch_embed(image_bchw, weight_fcpp, bias_f, patch_size_px,
                *, tile_m=512, compute_dtype="auto"):
    """Pallas implementation of PatchEmbed.forward.

    image_bchw  : (B, C, H, W)
    weight_fcpp : (F, C, p, p)   -- same layout as nn.Conv2d.weight
    bias_f      : (F,)
    returns (tokens (B, N, F), (Hp, Wp))
    """
    B, C, H, W = image_bchw.shape
    F, Cw, ph, pw = weight_fcpp.shape
    assert C == Cw and ph == patch_size_px and pw == patch_size_px
    assert H % patch_size_px == 0 and W % patch_size_px == 0
    p = patch_size_px
    Hp, Wp = H // p, W // p
    N = Hp * Wp
    M = B * N
    K = C * p * p
    out_dtype = image_bchw.dtype

    # bf16 operands by default (native MXU rate on all generations); the
    # accumulator stays f32 via preferred_element_type and the bias stays f32.
    if compute_dtype == "auto":
        compute_dtype = jnp.bfloat16 if image_bchw.dtype == jnp.float32 else None
    if compute_dtype is not None:
        image_bchw = image_bchw.astype(compute_dtype)
        weight_fcpp = weight_fcpp.astype(compute_dtype)

    vmem_cap, k_align = _chip_params()

    # --- patch extraction -> (M, Kp).  K ordered (C, ph, pw) to match the
    # Conv2d weight flattening; zero-pad K so the x tile's last dim is
    # lane-dense and MXU passes are full.  Materialized once in HBM.
    Kp = _round_up(K, k_align)
    x = image_bchw.reshape(B, C, Hp, p, Wp, p)            # B C Hp ph Wp pw
    x = jnp.transpose(x, (0, 2, 4, 1, 3, 5))              # B Hp Wp C ph pw
    x = x.reshape(M, K)
    if Kp != K:
        x = jnp.pad(x, ((0, 0), (0, Kp - K)))

    # --- lane-dense output: pad F up to a multiple of 128 (zeros).
    Fp = _round_up(F, 128)
    w = weight_fcpp.reshape(F, K).T                       # (K, F)
    pad_k, pad_f = Kp - K, Fp - F
    if pad_k or pad_f:
        w = jnp.pad(w, ((0, pad_k), (0, pad_f)))
    b = bias_f.astype(jnp.float32)                        # bias kept in f32
    if pad_f:
        b = jnp.pad(b, (0, pad_f))
    b = b.reshape(1, Fp)

    x_bytes = jnp.dtype(x.dtype).itemsize
    o_bytes = jnp.dtype(out_dtype).itemsize

    # --- M tile: layout friendly, >= 2 grid steps when M allows (v7x megacore).
    m_aligned = _round_up(M, 8)
    if m_aligned <= 16:
        TM = m_aligned
    else:
        TM = min(tile_m, _round_up(pl.cdiv(m_aligned, 2), 8))

    def _footprint(tm):
        # double-buffered x/out tiles + (conservatively) double-counted
        # resident weight & bias buffers.
        return (2 * tm * Kp * x_bytes + 2 * Kp * Fp * x_bytes
                + 2 * tm * Fp * o_bytes + 2 * Fp * 4)

    budget = int(0.85 * vmem_cap)
    while TM > 8 and _footprint(TM) > budget:
        TM = max(8, _round_up(TM // 2, 8))
    grid = (pl.cdiv(M, TM),)   # boundary block masked by Pallas; no M padding

    vmem_limit = int(min(max(int(1.5 * _footprint(TM)), 32 << 20), budget))

    cost = pl.CostEstimate(
        flops=2 * M * Kp * Fp,
        transcendentals=0,
        bytes_accessed=(M * Kp * x_bytes + Kp * Fp * x_bytes
                        + M * Fp * o_bytes + Fp * 4),
    )

    # TODO(synk): for very large F (>= 2048) add a second "parallel" grid axis
    # over F so the resident weight block stays within v7x's 64 MiB VMEM, and
    # mark the resident weight/bias specs pipeline_mode=pl.Buffered(1) to drop
    # their redundant second VMEM buffer.
    out = pl.pallas_call(
        _patch_embed_kernel,
        out_shape=jax.ShapeDtypeStruct((M, Fp), out_dtype),
        grid_spec=pl.GridSpec(
            grid=grid,
            in_specs=[
                pl.BlockSpec((TM, Kp), lambda i: (i, 0)),
                pl.BlockSpec((Kp, Fp), lambda i: (0, 0)),  # weight resident
                pl.BlockSpec((1, Fp), lambda i: (0, 0)),   # bias resident (f32)
            ],
            out_specs=pl.BlockSpec((TM, Fp), lambda i: (i, 0)),
        ),
        compiler_params=pltpu.CompilerParams(
            dimension_semantics=("parallel",),
            vmem_limit_bytes=vmem_limit,
        ),
        cost_estimate=cost,
    )(x, w, b)

    tokens = out if Fp == F else out[:, :F]
    tokens = tokens.reshape(B, N, F)
    return tokens, (Hp, Wp)


if __name__ == "__main__":
    # Small config consistent with the module: B=2, C=3, H=W=16, patch=8, F=32.
    B, C, H, W = 2, 3, 16, 16
    patch = 8
    F = 32

    key = jax.random.PRNGKey(0)
    k_img, k_w, k_b = jax.random.split(key, 3)
    image = jax.random.normal(k_img, (B, C, H, W), dtype=jnp.float32)
    # Deterministic parameters (shapes of nn.Conv2d(C, F, patch, patch, bias=True)).
    weight = jax.random.normal(k_w, (F, C, patch, patch), dtype=jnp.float32) * 0.02
    bias = jax.random.normal(k_b, (F,), dtype=jnp.float32) * 0.02

    tokens, grid_hw = patch_embed(image, weight, bias, patch)
    tokens = jax.block_until_ready(tokens)

    # Reference (stride==kernel conv as matmul), matching the kernel's default
    # bf16-operand / f32-accumulate arithmetic.
    Hp, Wp = H // patch, W // patch
    x_ref = image.reshape(B, C, Hp, patch, Wp, patch)
    x_ref = jnp.transpose(x_ref, (0, 2, 4, 1, 3, 5)).reshape(
        B, Hp * Wp, C * patch * patch)
    w_ref = weight.reshape(F, -1).T
    ref_bf16 = jnp.dot(x_ref.astype(jnp.bfloat16), w_ref.astype(jnp.bfloat16),
                       preferred_element_type=jnp.float32) + bias[None, None, :]
    ref_bf16 = ref_bf16.astype(jnp.float32)
    ref_f32 = x_ref @ w_ref + bias[None, None, :]

    assert tokens.shape == (B, Hp * Wp, F)
    assert tokens.dtype == image.dtype
    assert grid_hw == (Hp, Wp)
    assert jnp.allclose(tokens, ref_bf16, atol=1e-2, rtol=1e-2)
    assert jnp.allclose(tokens, ref_f32, atol=3e-2, rtol=3e-2)
    print("KERNEL_OK")
</pallas_src>

<mosaic_0001>
module attributes {stable_mosaic.version = 11 : i64} {
  func.func @_patch_embed_kernel(%arg0: i32, %arg1: memref<8x256xbf16, #tpu.memory_space<vmem>>, %arg2: memref<256x128xbf16, #tpu.memory_space<vmem>>, %arg3: memref<1x128xf32, #tpu.memory_space<vmem>>, %arg4: memref<8x128xf32, #tpu.memory_space<vmem>>) attributes {dimension_semantics = [#tpu.dimension_semantics<parallel>], iteration_bounds = array<i64: 1>, scalar_prefetch = 0 : i64, scratch_operands = 0 : i64, tpu.core_type = #tpu.core_type<tc>, window_params = [{transform_indices = @transform_0, window_bounds = array<i64: 8, 256>}, {pipeline_mode = #tpu.pipeline_mode<synchronous>, transform_indices = @transform_1, window_bounds = array<i64: 256, 128>}, {pipeline_mode = #tpu.pipeline_mode<synchronous>, transform_indices = @transform_2, window_bounds = array<i64: 1, 128>}, {transform_indices = @transform_3, window_bounds = array<i64: 8, 128>}]} {
    %c0 = arith.constant 0 : index
    %c0_0 = arith.constant 0 : index
    %0 = vector.load %arg1[%c0, %c0_0] : memref<8x256xbf16, #tpu.memory_space<vmem>>, vector<8x256xbf16>
    %c0_1 = arith.constant 0 : index
    %c0_2 = arith.constant 0 : index
    %1 = vector.load %arg2[%c0_1, %c0_2] : memref<256x128xbf16, #tpu.memory_space<vmem>>, vector<256x128xbf16>
    %cst = arith.constant dense<0.000000e+00> : vector<8x128xf32>
    %2 = tpu.matmul %0, %1, %cst {dimension_numbers = #tpu.dot_dimension_numbers<[1], [0], [0], [1], [0, 0, 1, 1], [], []>} : vector<8x256xbf16>, vector<256x128xbf16>, vector<8x128xf32> -> vector<8x128xf32>
    %c0_3 = arith.constant 0 : index
    %c0_4 = arith.constant 0 : index
    %3 = vector.load %arg3[%c0_3, %c0_4] : memref<1x128xf32, #tpu.memory_space<vmem>>, vector<1x128xf32>
    %4 = vector.broadcast %3 : vector<1x128xf32> to vector<8x128xf32>
    %5 = arith.addf %2, %4 : vector<8x128xf32>
    %c0_5 = arith.constant 0 : index
    %c0_6 = arith.constant 0 : index
    %6 = vector.load %arg4[%c0_5, %c0_6] : memref<8x128xf32, #tpu.memory_space<vmem>>, vector<8x128xf32>
    tpu.vector_store %arg4[%c0_5, %c0_6], %5 {strides = array<i32>} : memref<8x128xf32, #tpu.memory_space<vmem>>, vector<8x128xf32>,
    return
  }
  func.func @transform_0(%arg0: i32) -> (i32, i32) {
    %c0_i32 = arith.constant 0 : i32
    %c0_i32_0 = arith.constant 0 : i32
    return %arg0, %c0_i32 : i32, i32
  }
  func.func @transform_1(%arg0: i32) -> (i32, i32) {
    %c0_i32 = arith.constant 0 : i32
    %c0_i32_0 = arith.constant 0 : i32
    %c0_i32_1 = arith.constant 0 : i32
    return %c0_i32, %c0_i32_0 : i32, i32
  }
  func.func @transform_2(%arg0: i32) -> (i32, i32) {
    %c0_i32 = arith.constant 0 : i32
    %c0_i32_0 = arith.constant 0 : i32
    %c0_i32_1 = arith.constant 0 : i32
    return %c0_i32, %c0_i32_0 : i32, i32
  }
  func.func @transform_3(%arg0: i32) -> (i32, i32) {
    %c0_i32 = arith.constant 0 : i32
    %c0_i32_0 = arith.constant 0 : i32
    return %arg0, %c0_i32 : i32, i32
  }
}

</mosaic_0001>

<bundles_post_ra>
// kernel: tpu_custom_call.1
= control target key start
LH: loop header
LB: loop body
LE: loop exit
PB: predicated region body
PF: predicated region fallthrough
CT: control target
= control target key end

     0   :  { %8 = vsyncpa [#allocation3], 0  ;;  %s431_s0 = inlined_call_operand.hbm [shape: bf16[8,256], index: 0, kind: input, shape index: {}]   ;;  %s432_s1 = inlined_call_operand.hbm [shape: bf16[256,128], index: 1, kind: input, shape index: {}]   ;;  %s433_s2 = inlined_call_operand.vmem [shape: f32[1,128], index: 2, kind: input, shape index: {}]   ;;  %s434_s3 = inlined_call_operand.hbm [shape: f32[8,128], index: 3, kind: output, shape index: {}]  }
   0x1   :  { %9 = vsyncpa [#allocation6], 0 }
   0x2   :  { %10 = vsyncpa [#allocation4], 0  ;;  %s16_s14 = sshll.u32 %s431_s0, 4  ;;  %s394_s15 = smov [#allocation2]   ;;  %s17_s14 = int_to_ptr.hbm [resolvable:$true] %s16_s14 }
   0x3   :  { %s18_s16 = sshll.u32 %s394_s15, 4  ;;  %s26_s19 = sshll.u32 %s432_s1, 4  ;;  %s19_s16 = int_to_ptr.vmem [resolvable:$true] %s18_s16  ;;  %s27_s19 = int_to_ptr.hbm [resolvable:$true] %s26_s19 }
   0x4   :  { %21 = dma.hbm_to_vmem [thread:$0]  %s17_s14, 128, %s19_s16, [#allocation3]  }
   0x5   :  { %s395_s20 = smov [#allocation5]   ;;  %s396_s22 = smov 64  }
   0x6   :  { %s28_s21 = sshll.u32 %s395_s20, 4  ;;  %s397_s23 = smov 4   ;;  %s29_s21 = int_to_ptr.vmem [resolvable:$true] %s28_s21 }
   0x7   :  { %34 = dma.hbm_to_vmem [thread:$0]  %s27_s19, 2048, %s29_s21, [#allocation6], %s396_s22, %s396_s22, %s397_s23  }
   0x8   :  { %388 = dma.done.wait [#allocation3], 128  }
   0x9   :  { %389 = vsyncadd [#allocation3], 4294967168 }
   0xa   :  { %390 = dma.done.wait [#allocation6], 2048  }
   0xb   :  { %391 = vsyncadd [#allocation6], 4294965248  ;;  %v301_v0 = vld [vmem:[#allocation5 + $0x38] sm:$0xff]  ;;  %v300_v2 = vld [vmem:[#allocation5 + $0x30] sm:$0xff]  ;;  %s398_s24 = smov [#allocation7]   ;;  %s219_s28 = sshll.u32 %s434_s3, 4  ;;  %s220_s28 = int_to_ptr.hbm [resolvable:$true] %s219_s28 }
   0xc   :  { %v309_v1 = vld [vmem:[#allocation5 + $0x78] sm:$0xff]  ;;  %185 = vmatpush.bf16.msra.mxu0 %v301_v0  ;;  %v308_v3 = vld [vmem:[#allocation5 + $0x70] sm:$0xff]  ;;  %v299_v4 = vld [vmem:[#allocation5 + $0x28] sm:$0xff]  ;;  %s217_s25 = sshll.u32 %s398_s24, 4  ;;  %s218_s25 = int_to_ptr.vmem [resolvable:$true] %s217_s25 }
   0xd   :  { %198 = vmatpush.bf16.msra.mxu1 %v309_v1  ;;  %v307_v5 = vld [vmem:[#allocation5 + $0x68] sm:$0xff]  ;;  %v298_v6 = vld [vmem:[#allocation5 + $0x20] sm:$0xff]  ;;  %v297_v8 = vld [vmem:[#allocation5 + $0x18] sm:$0xff] }
   0xe   :  { %v306_v7 = vld [vmem:[#allocation5 + $0x60] sm:$0xff]  ;;  %v305_v9 = vld [vmem:[#allocation5 + $0x58] sm:$0xff]  ;;  %v296_v10 = vld [vmem:[#allocation5 + $0x10] sm:$0xff] }
   0xf   :  { %v304_v11 = vld [vmem:[#allocation5 + $0x50] sm:$0xff]  ;;  %v295_v12 = vld [vmem:[#allocation5 + $0x8] sm:$0xff]  ;;  %v45_v14 = vld [vmem:[#allocation2] sm:$0xff] }
  0x10   :  { %186 = vmatpush.bf16.msra.mxu0 %v300_v2  ;;  %v303_v13 = vld [vmem:[#allocation5 + $0x48] sm:$0xff]  ;;  %v83_v15 = vunpack.c.l.b16 %v45_v14  ;;  %v84_v16 = vunpack.c.h.b16 %v45_v14  ;;  %v294_v17 = vld [vmem:[#allocation5] sm:$0xff]  ;;  %v315_v21 = vld [vmem:[%s433_s2] ss:$0 sm:$0xff] }
  0x11   :  { %199 = vmatpush.bf16.msra.mxu1 %v308_v3  ;;  %v302_v18 = vld [vmem:[#allocation5 + $0x40] sm:$0xff] }
  0x12   :  { %v85_v19 = vpack.c.b16 %v83_v15, %v83_v15  ;;  %v86_v20 = vpack.c.b16 %v84_v16, %v84_v16 }
  0x14   :  { %187 = vmatpush.bf16.msra.mxu0 %v299_v4 }
  0x15   :  { %200 = vmatpush.bf16.msra.mxu1 %v307_v5 }
  0x18   :  { %188 = vmatpush.bf16.msra.mxu0 %v298_v6 }
  0x19   :  { %201 = vmatpush.bf16.msra.mxu1 %v306_v7 }
  0x1c   :  { %189 = vmatpush.bf16.msra.mxu0 %v297_v8 }
  0x1d   :  { %202 = vmatpush.bf16.msra.mxu1 %v305_v9 }
  0x20   :  { %190 = vmatpush.bf16.msra.mxu0 %v296_v10 }
  0x21   :  { %203 = vmatpush.bf16.msra.mxu1 %v304_v11 }
  0x24   :  { %191 = vmatpush.bf16.msra.mxu0 %v295_v12 }
  0x25   :  { %204 = vmatpush.bf16.msra.mxu1 %v303_v13 }
  0x28   :  { %192 = vmatpush.bf16.msra.mxu0 %v294_v17 }
  0x29   :  { %205 = vmatpush.bf16.msra.mxu1 %v302_v18 }
  0x2b   :  { %193 = vmatmul.bf16.vlgmr.msra.gmra.mxu0 %v85_v19 }
  0x2c   :  { %206 = vmatmul.bf16.vlgmr.msra.gmra.mxu1 %v86_v20 }
  0xa8   :  { %v194_v22 = vpop.f32.mrf.mxu0 }
  0xa9   :  { %v207_v23 = vpop.f32.mrf.mxu1  ;;  %v195_v24 = vadd.f32 %v315_v21, %v194_v22 }
  0xab   :  { %v208_v25 = vadd.f32 %v207_v23, %v195_v24 }
  0xad   :  { %211 = vst [vmem:[#allocation7] sm:$0xff] %v208_v25 }
  0xae   :  { %222 = dma.vmem_to_hbm [thread:$0]  %s218_s25, 128, %s220_s28, [#allocation4]  }
  0xb0   :  { %v196_v26 = vpop.f32.mrf.mxu0 }
  0xb1   :  { %v209_v27 = vpop.f32.mrf.mxu1 }
  0xb2   :  { %392 = dma.done.wait [#allocation4], 128  }
  0xb3   :  { %393 = vsyncadd [#allocation4], 4294967168 }
  0xb4   :  { %227 = vsyncpa [#allocation3], 1 }
  0xb5   :  { %228 = vsyncpa [#allocation6], 1 }
  0xb6   :  { %229 = vsyncpa [#allocation4], 1 }

</bundles_post_ra>
